<compile_context>
chip_gen: v6e
topology: v6e:2x2x1
jax: 0.10.0
libtpu: 0.0.40
codegen_flags: <defaults>
</compile_context>

<pallas_src>
import jax
import jax.numpy as jnp
from jax.experimental import pallas as pl
from jax.experimental.pallas import tpu as pltpu


# ---------------------------------------------------------------------------
# Kernel: each grid step issues one HBM->HBM DMA for its chunk of rows.
# ---------------------------------------------------------------------------
def _make_hbm_copy_kernel(chunk_rows):
    def kernel(x_hbm, o_hbm, sem):
        i = pl.program_id(0)
        start = pl.multiple_of(i * chunk_rows, chunk_rows)
        cp = pltpu.make_async_copy(
            x_hbm.at[pl.ds(start, chunk_rows), :],
            o_hbm.at[pl.ds(start, chunk_rows), :],
            sem,
        )
        cp.start()
        cp.wait()
    return kernel


_CHUNK_BYTES_TARGET = 8 << 20   # ~8 MiB per DMA chunk
_MIN_SPLIT_BYTES = 2 << 20      # below this, a single DMA descriptor is optimal


def _pick_num_chunks(rows, row_bytes):
    """Even chunk count (v7x: both TCs) dividing `rows`, ~8 MiB per chunk.
    Small arrays get a single DMA descriptor."""
    total_bytes = rows * row_bytes
    if rows < 2 or total_bytes < _MIN_SPLIT_BYTES:
        return 1
    want = max(2, pl.cdiv(total_bytes, _CHUNK_BYTES_TARGET))
    if want % 2:
        want += 1
    want = min(want, rows, 256)
    for n in range(want, 1, -1):          # prefer even counts dividing rows
        if n % 2 == 0 and rows % n == 0:
            return n
    return 2 if rows % 2 == 0 else 1


def _identity_copy_pallas(x):
    """Identity via direct HBM->HBM DMA (kernel-parity path)."""
    total = x.size
    itemsize = jnp.dtype(x.dtype).itemsize

    if total % 128 == 0:
        rows, lane = total // 128, 128    # many rows -> flexible, even chunking
    else:
        rows, lane = 1, total             # single whole-buffer DMA
    x2d = x.reshape(rows, lane)

    num_chunks = _pick_num_chunks(rows, lane * itemsize)
    chunk_rows = rows // num_chunks

    y2d = pl.pallas_call(
        _make_hbm_copy_kernel(chunk_rows),
        out_shape=jax.ShapeDtypeStruct((rows, lane), x.dtype),
        grid_spec=pltpu.PrefetchScalarGridSpec(
            num_scalar_prefetch=0,
            grid=(num_chunks,),
            in_specs=[pl.BlockSpec(memory_space=pl.ANY)],
            out_specs=pl.BlockSpec(memory_space=pl.ANY),
            scratch_shapes=[pltpu.SemaphoreType.DMA(())],
        ),
        compiler_params=pltpu.CompilerParams(
            dimension_semantics=("parallel",),
        ),
        cost_estimate=pl.CostEstimate(
            flops=0,
            transcendentals=0,
            bytes_accessed=2 * total * itemsize,
        ),
    )(x2d)
    return y2d.reshape(x.shape)


def _identity(x, use_kernel=False):
    """Identity. Default: return the input untouched (no kernel, no HBM traffic).
    With use_kernel=True, run the HBM->HBM DMA copy kernel for parity."""
    x = jnp.asarray(x)
    if not use_kernel or x.size == 0:
        return x
    return _identity_copy_pallas(x)


class EmptyPallas:
    """JAX/Pallas equivalent of torchplus.Empty (no parameters)."""

    def __init__(self, *args, use_kernel=False, **kwargs):
        # Empty.__init__ ignores all args; no parameters to initialize.
        self._use_kernel = use_kernel

    def __call__(self, *args, **kwargs):
        if len(args) == 1:
            return _identity(args[0], use_kernel=self._use_kernel)
        elif len(args) == 0:
            return None
        # Multi-arg: pass inputs straight through (no per-argument launches).
        return tuple(jnp.asarray(a) for a in args)


if __name__ == "__main__":
    key = jax.random.PRNGKey(0)
    k1, k2, k3, k4 = jax.random.split(key, 4)

    # NCHW feature-map-like input and a second arbitrary tensor.
    x = jax.random.normal(k1, (2, 4, 16, 16), dtype=jnp.float32)
    b = jax.random.normal(k2, (2, 8, 32), dtype=jnp.float32)

    # --- Production path: pure pass-through (review's top optimization). ---
    fast = EmptyPallas()
    y_fast = fast(x)
    jax.block_until_ready(y_fast)
    assert y_fast.shape == x.shape and y_fast.dtype == x.dtype
    assert jnp.array_equal(y_fast, x)

    assert fast() is None

    outs = fast(x, b)
    jax.block_until_ready(outs)
    assert isinstance(outs, tuple) and len(outs) == 2
    assert jnp.array_equal(outs[0], x) and jnp.array_equal(outs[1], b)

    # --- Kernel-parity path: HBM->HBM DMA copy. ---
    kern = EmptyPallas(use_kernel=True)

    # 1) Small array: single DMA descriptor (grid=(1,)).
    y_kern = kern(x)
    jax.block_until_ready(y_kern)
    assert y_kern.shape == x.shape and y_kern.dtype == x.dtype
    assert jnp.array_equal(y_kern, x)

    # 2) Larger array (2 MiB): exercises the even multi-chunk "parallel" grid.
    big = jax.random.normal(k3, (2, 64, 64, 64), dtype=jnp.float32)
    y_big = kern(big)
    jax.block_until_ready(y_big)
    assert y_big.shape == big.shape and y_big.dtype == big.dtype
    assert jnp.array_equal(y_big, big)

    # 3) Odd-sized array (not a multiple of 128): whole-buffer DMA fallback.
    odd = jax.random.normal(k4, (3, 5, 7), dtype=jnp.float32)
    y_odd = kern(odd)
    jax.block_until_ready(y_odd)
    assert y_odd.shape == odd.shape and jnp.array_equal(y_odd, odd)

    print("KERNEL_OK")
</pallas_src>

<mosaic_0001>
module attributes {stable_mosaic.version = 11 : i64} {
  func.func @kernel(%arg0: i32, %arg1: memref<16x128xf32, #tpu.memory_space<any>>, %arg2: memref<16x128xf32, #tpu.memory_space<any>>, %arg3: memref<!tpu.dma_semaphore, #tpu.memory_space<semaphore_mem>>) attributes {dimension_semantics = [#tpu.dimension_semantics<parallel>], iteration_bounds = array<i64: 1>, scalar_prefetch = 0 : i64, scratch_operands = 1 : i64, tpu.core_type = #tpu.core_type<tc>, window_params = [{}, {}]} {
    %c16_i32 = arith.constant 16 : i32
    %0 = arith.muli %arg0, %c16_i32 : i32
    %1 = tpu.assume_multiple %0, 16 : i32
    %c0_i32 = arith.constant 0 : i32
    %2 = tpu.memref_slice %arg1[%1, %c0_i32] : memref<16x128xf32, #tpu.memory_space<any>> -> memref<16x128xf32, #tpu.memory_space<any>>
    %c0_i32_0 = arith.constant 0 : i32
    %3 = tpu.memref_slice %arg2[%1, %c0_i32_0] : memref<16x128xf32, #tpu.memory_space<any>> -> memref<16x128xf32, #tpu.memory_space<any>>
    tpu.enqueue_dma source(%2 : memref<16x128xf32, #tpu.memory_space<any>>) target(%3 : memref<16x128xf32, #tpu.memory_space<any>>) target_semaphore(%arg3 : memref<!tpu.dma_semaphore, #tpu.memory_space<semaphore_mem>>)
    %c0_i32_1 = arith.constant 0 : i32
    %4 = tpu.memref_slice %arg1[%1, %c0_i32_1] : memref<16x128xf32, #tpu.memory_space<any>> -> memref<16x128xf32, #tpu.memory_space<any>>
    %c0_i32_2 = arith.constant 0 : i32
    %5 = tpu.memref_slice %arg2[%1, %c0_i32_2] : memref<16x128xf32, #tpu.memory_space<any>> -> memref<16x128xf32, #tpu.memory_space<any>>
    tpu.wait_dma2 semaphore(%arg3 : memref<!tpu.dma_semaphore, #tpu.memory_space<semaphore_mem>>) src(%4 : memref<16x128xf32, #tpu.memory_space<any>>) dst(%5 : memref<16x128xf32, #tpu.memory_space<any>>)
    return
  }
}

</mosaic_0001>

<bundles_post_ra>
// kernel: tpu_custom_call.1
= control target key start
LH: loop header
LB: loop body
LE: loop exit
PB: predicated region body
PF: predicated region fallthrough
CT: control target
= control target key end

     0   :  { %s33_s6 = smov [#allocation2]   ;;  %s34_s7 = smov 131072   ;;  %s52_s0 = inlined_call_operand.hbm [shape: f32[16,128], index: 0, kind: input, shape index: {}]   ;;  %s53_s1 = inlined_call_operand.hbm [shape: f32[16,128], index: 1, kind: output, shape index: {}]  }
   0x1   :  { %s35_s8 = smov 0  }
   0x2   :  { %17 = dma.general %s52_s0, 256, %s53_s1, %s33_s6, %s34_s7, [#allocation4], %s35_s8, 0  }
   0x3   :  { %31 = dma.done.wait [#allocation2], 256 }
   0x4   :  { %32 = vsyncadd [#allocation2], 4294967040 }
   0x5   :  { %21 = vsyncmov [#allocation2] }
   0x8   :  { %s22_s13 = vpop.sfrf %21 }
   0x9   :  { %p27_p0 = scmp.ne.s32.totalorder %s22_s13, 0 }
   0xb   :  { %26 = shalt.err (%p27_p0)  }

</bundles_post_ra>
